<compile_context>
chip_gen: v6e
topology: v6e:2x2x1
jax: 0.10.0
libtpu: 0.0.40
codegen_flags: <defaults>
</compile_context>

<pallas_src>
import jax
import jax.numpy as jnp
from jax.experimental import pallas as pl
from jax.experimental.pallas import tpu as pltpu


def _h_swish_kernel(x_ref, o_ref):
    x = x_ref[...]
    native = x.dtype in (jnp.dtype(jnp.float32), jnp.dtype(jnp.bfloat16))
    xf = x if native else x.astype(jnp.float32)
    # h_sigmoid(x) = relu6(x + 3) / 6 ; h_swish(x) = x * h_sigmoid(x)
    gate = jnp.clip(xf + 3.0, 0.0, 6.0) * (1.0 / 6.0)
    o_ref[...] = (xf * gate).astype(o_ref.dtype)


def _sublane(itemsize: int) -> int:
    # Native vreg sublane tile: 8 rows @ 4B, 16 @ 2B, 32 @ 1B.
    return max(8, 32 // itemsize)


def _pick_2d_view(x: jax.Array) -> jax.Array:
    """Reshape (free, contiguous) to a lane-dense 2D slab without padding."""
    n = x.size
    sub = _sublane(jnp.dtype(x.dtype).itemsize)
    fallback_lane = None
    for lane in (2048, 1024, 512, 256, 128):
        if n % lane == 0:
            rows = n // lane
            if rows >= sub:
                return x.reshape(rows, lane)          # lane-dense, dense vregs
            if fallback_lane is None:
                fallback_lane = lane
    if fallback_lane is not None:
        return x.reshape(n // fallback_lane, fallback_lane)  # tiny, still lane-dense
    # Ragged total size: keep the trailing dim as the lane axis. The block's
    # last dim equals the full array dim, so no pad/slice passes are needed;
    # the grid handles the row remainder via a partial last block.
    if x.ndim >= 2:
        return x.reshape(-1, x.shape[-1])
    return x.reshape(1, n)


def _pick_block_rows(rows: int, lane: int, itemsize: int) -> int:
    """Byte-capped block rows; cdiv grid handles any row remainder."""
    sub = _sublane(itemsize)
    row_bytes = lane * itemsize
    total_bytes = rows * row_bytes

    MAX_BLOCK_BYTES = 2 * 1024 * 1024   # 4 dbl-buffered blocks = 8 MiB (< v5e default)
    MIN_BLOCK_BYTES = 1 * 1024 * 1024   # don't split below this just to add steps
    TARGET_STEPS = 8                    # v7x: 2 TCs x >=4 pipelined steps each

    # Tiny inputs: single full-array block (block dims == array dims is legal).
    if total_bytes <= MIN_BLOCK_BYTES or rows <= sub:
        return rows

    # Byte-capped block, multiple of the native sublane tile.
    # NOTE: shapes with a single ragged row wider than the cap are not tiled
    # further (rare; last dim must equal the full dim when not 128-aligned).
    cap_rows = max(sub, (MAX_BLOCK_BYTES // row_bytes) // sub * sub)
    block_rows = min(cap_rows, rows)

    # Ensure enough grid steps for megacore sharding + DMA/compute overlap,
    # without dropping below ~1 MiB per block.
    if pl.cdiv(rows, block_rows) < TARGET_STEPS:
        want = max(MIN_BLOCK_BYTES // row_bytes, pl.cdiv(rows, TARGET_STEPS))
        want = max(sub, pl.cdiv(want, sub) * sub)
        block_rows = min(want, rows)
    return block_rows


def h_swish(x: jax.Array) -> jax.Array:
    """Elementwise h_swish on an arbitrary-shaped array (NCHW expected)."""
    orig_shape = x.shape
    n = x.size
    if n == 0:
        return x

    x2d = _pick_2d_view(x)
    rows, lane = x2d.shape
    itemsize = jnp.dtype(x.dtype).itemsize
    block_rows = _pick_block_rows(rows, lane, itemsize)
    grid = (pl.cdiv(rows, block_rows),)

    out2d = pl.pallas_call(
        _h_swish_kernel,
        out_shape=jax.ShapeDtypeStruct((rows, lane), x.dtype),
        grid_spec=pltpu.PrefetchScalarGridSpec(
            num_scalar_prefetch=0,
            grid=grid,
            in_specs=[pl.BlockSpec((block_rows, lane), lambda i: (i, 0))],
            out_specs=pl.BlockSpec((block_rows, lane), lambda i: (i, 0)),
        ),
        compiler_params=pltpu.CompilerParams(
            dimension_semantics=("parallel",),
        ),
    )(x2d)

    return out2d.reshape(orig_shape)


def h_swish_ref(x: jax.Array) -> jax.Array:
    return x * (jnp.clip(x + 3.0, 0.0, 6.0) * (1.0 / 6.0))


if __name__ == "__main__":
    key = jax.random.PRNGKey(0)

    # NCHW input, as fed to the PyTorch module (small demo shape).
    x = jax.random.normal(key, (2, 4, 16, 16), dtype=jnp.float32) * 4.0
    out = h_swish(x)
    jax.block_until_ready(out)
    assert out.shape == x.shape and out.dtype == x.dtype
    assert jnp.allclose(out, h_swish_ref(x), atol=1e-6, rtol=1e-5)

    # Ragged total size (exercises the no-pad ragged-lane path).
    x2 = jax.random.normal(jax.random.PRNGKey(1), (3, 5, 7, 11), dtype=jnp.float32)
    out2 = h_swish(x2)
    jax.block_until_ready(out2)
    assert jnp.allclose(out2, h_swish_ref(x2), atol=1e-6, rtol=1e-5)

    # Medium array (exercises the multi-step byte-capped grid).
    x3 = jax.random.normal(jax.random.PRNGKey(2), (8, 32, 64, 64), dtype=jnp.float32)
    out3 = h_swish(x3)
    jax.block_until_ready(out3)
    assert jnp.allclose(out3, h_swish_ref(x3), atol=1e-6, rtol=1e-5)

    # Row count not a multiple of block_rows (exercises the partial last block).
    x4 = jax.random.normal(jax.random.PRNGKey(3), (5, 13, 64, 64), dtype=jnp.float32)
    out4 = h_swish(x4)
    jax.block_until_ready(out4)
    assert jnp.allclose(out4, h_swish_ref(x4), atol=1e-6, rtol=1e-5)

    # bf16 (exercises the dtype-aware sublane granularity + native bf16 gate).
    x5 = (jax.random.normal(jax.random.PRNGKey(4), (2, 8, 32, 32)) * 4.0).astype(jnp.bfloat16)
    out5 = h_swish(x5)
    jax.block_until_ready(out5)
    assert out5.dtype == jnp.bfloat16
    assert jnp.allclose(out5.astype(jnp.float32),
                        h_swish_ref(x5.astype(jnp.float32)), atol=5e-2, rtol=5e-2)

    print("KERNEL_OK")
</pallas_src>

<mosaic_0001>
module attributes {stable_mosaic.version = 11 : i64} {
  func.func @_h_swish_kernel(%arg0: i32, %arg1: memref<8x256xf32, #tpu.memory_space<vmem>>, %arg2: memref<8x256xf32, #tpu.memory_space<vmem>>) attributes {dimension_semantics = [#tpu.dimension_semantics<parallel>], iteration_bounds = array<i64: 1>, scalar_prefetch = 0 : i64, scratch_operands = 0 : i64, tpu.core_type = #tpu.core_type<tc>, window_params = [{transform_indices = @transform_0, window_bounds = array<i64: 8, 256>}, {transform_indices = @transform_1, window_bounds = array<i64: 8, 256>}]} {
    %c0 = arith.constant 0 : index
    %c0_0 = arith.constant 0 : index
    %0 = vector.load %arg1[%c0, %c0_0] : memref<8x256xf32, #tpu.memory_space<vmem>>, vector<8x256xf32>
    %cst = arith.constant 3.000000e+00 : f32
    %1 = vector.broadcast %cst : f32 to vector<8x256xf32>
    %2 = arith.addf %0, %1 : vector<8x256xf32>
    %cst_1 = arith.constant 0.000000e+00 : f32
    %cst_2 = arith.constant 6.000000e+00 : f32
    %3 = vector.broadcast %cst_1 : f32 to vector<8x256xf32>
    %4 = arith.maximumf %3, %2 : vector<8x256xf32>
    %5 = vector.broadcast %cst_2 : f32 to vector<8x256xf32>
    %6 = arith.minimumf %5, %4 : vector<8x256xf32>
    %cst_3 = arith.constant 0.166666672 : f32
    %7 = vector.broadcast %cst_3 : f32 to vector<8x256xf32>
    %8 = arith.mulf %6, %7 : vector<8x256xf32>
    %9 = arith.mulf %0, %8 : vector<8x256xf32>
    %c0_4 = arith.constant 0 : index
    %c0_5 = arith.constant 0 : index
    %10 = vector.load %arg2[%c0_4, %c0_5] : memref<8x256xf32, #tpu.memory_space<vmem>>, vector<8x256xf32>
    tpu.vector_store %arg2[%c0_4, %c0_5], %9 {strides = array<i32>} : memref<8x256xf32, #tpu.memory_space<vmem>>, vector<8x256xf32>,
    return
  }
  func.func @transform_0(%arg0: i32) -> (i32, i32) {
    %c0_i32 = arith.constant 0 : i32
    %c0_i32_0 = arith.constant 0 : i32
    return %arg0, %c0_i32 : i32, i32
  }
  func.func @transform_1(%arg0: i32) -> (i32, i32) {
    %c0_i32 = arith.constant 0 : i32
    %c0_i32_0 = arith.constant 0 : i32
    return %arg0, %c0_i32 : i32, i32
  }
}

</mosaic_0001>

<bundles_post_ra>
// kernel: tpu_custom_call.1
= control target key start
LH: loop header
LB: loop body
LE: loop exit
PB: predicated region body
PF: predicated region fallthrough
CT: control target
= control target key end

     0   :  { %6 = vsyncpa [#allocation3], 0  ;;  %s114_s0 = inlined_call_operand.hbm [shape: f32[8,256], index: 0, kind: input, shape index: {}]   ;;  %s115_s1 = inlined_call_operand.hbm [shape: f32[8,256], index: 1, kind: output, shape index: {}]  }
   0x1   :  { %7 = vsyncpa [#allocation4], 0  ;;  %s96_s6 = smov [#allocation2]  }
   0x2   :  { %s14_s7 = sshll.u32 %s96_s6, 4  ;;  %s15_s7 = int_to_ptr.vmem [resolvable:$true] %s14_s7 }
   0x3   :  { %s60_s8 = scalar_lea.vmem %s15_s7, 256  ;;  %p65_p1 = scmp.lt.s32.totalorder %s15_s7, %s15_s7 }
   0x4   :  { %p61_p0 = scmp.ne.s32.totalorder %s15_s7, %s60_s8  ;;  %p66_p2 = scmp.lt.s32.totalorder %s60_s8, %s60_s8 }
   0x6   :  { %p67_p3 = por %p66_p2, %p65_p1 }
   0x8   :  { %p68_p4 = pnand %p67_p3, %p61_p0 }
   0xa   :  { %71 = shalt.err (!%p68_p4)
}
   0xb   :  { %17 = dma.hbm_to_vmem [thread:$0]  %s114_s0, 256, %s15_s7, [#allocation3]  }
   0xc   :  { %92 = dma.done.wait [#allocation3], 256  }
   0xd   :  { %93 = vsyncadd [#allocation3], 4294967040  ;;  %v21_v0 = vld [vmem:[#allocation2] sm:$0xff]  ;;  %v22_v1 = vld [vmem:[#allocation2 + $0x8] sm:$0xff]  ;;  %s97_s11 = smov [#allocation5]  }
   0xe   :  { %v23_v2 = vadd.f32 3.0, %v21_v0  ;;  %v24_v3 = vadd.f32 3.0, %v22_v1  ;;  %s41_s12 = sshll.u32 %s97_s11, 4  ;;  %s42_s12 = int_to_ptr.vmem [resolvable:$true] %s41_s12 }
   0xf   :  { %s72_s0 = scalar_lea.vmem %s42_s12, 256  ;;  %p77_p6 = scmp.lt.s32.totalorder %s42_s12, %s42_s12 }
  0x10   :  { %v25_v4 = vmax.f32 %v23_v2, 0.0  ;;  %v26_v5 = vmax.f32 %v24_v3, 0.0  ;;  %p73_p5 = scmp.ne.s32.totalorder %s42_s12, %s72_s0  ;;  %p78_p7 = scmp.lt.s32.totalorder %s72_s0, %s72_s0 }
  0x12   :  { %v27_v6 = vmin.f32 %v25_v4, 6.0  ;;  %v28_v7 = vmin.f32 %v26_v5, 6.0  ;;  %p79_p8 = por %p78_p7, %p77_p6 }
  0x14   :  { %v29_v8 = vmul.f32 0.16666667, %v27_v6  ;;  %v30_v9 = vmul.f32 0.16666667, %v28_v7  ;;  %p80_p9 = pnand %p79_p8, %p73_p5 }
  0x16   :  { %v31_v10 = vmul.f32 %v29_v8, %v21_v0  ;;  %v32_v11 = vmul.f32 %v30_v9, %v22_v1 }
  0x18   :  { %33 = vst [vmem:[#allocation5] sm:$0xff] %v31_v10  ;;  %34 = vst [vmem:[#allocation5 + $0x8] sm:$0xff] %v32_v11 }
  0x19   :  { %83 = shalt.err (!%p80_p9)
}
  0x1a   :  { %44 = dma.vmem_to_hbm [thread:$0]  %s42_s12, 256, %s115_s1, [#allocation4]  }
  0x1b   :  { %94 = dma.done.wait [#allocation4], 256  }
  0x1c   :  { %95 = vsyncadd [#allocation4], 4294967040 }
  0x1d   :  { %48 = vsyncpa [#allocation3], 1 }
  0x1e   :  { %49 = vsyncpa [#allocation4], 1 }

</bundles_post_ra>
